<compile_context>
chip_gen: v7x
topology: tpu7x:2x2x1
jax: 0.10.0
libtpu: 0.0.40
codegen_flags: <defaults>
</compile_context>

<pallas_src>
import jax
import jax.numpy as jnp
from jax.experimental import pallas as pl
from jax.experimental.pallas import tpu as pltpu


# ---------------------------------------------------------------------------
# Small helpers
# ---------------------------------------------------------------------------
def _round_up(x, m):
    return ((x + m - 1) // m) * m


def _vmem_limit_bytes():
    # Generation-aware VMEM budget: 128 MiB/TC on v5e/v6e, 64 MiB/TC on v7x.
    try:
        cap = int(pltpu.get_tpu_info().vmem_capacity_bytes)
    except Exception:
        cap = 64 * 1024 * 1024                      # conservative (v7x) fallback
    return min((cap * 5) // 8, 100 * 1024 * 1024)   # ~40 MB on v7x, ~80 MB on v5e/v6e


def _block_spec(shape, index_map, *, single_buffer=False):
    """BlockSpec, optionally single-buffered (stationary operands)."""
    if single_buffer:
        try:
            return pl.BlockSpec(shape, index_map, pipeline_mode=pl.Buffered(1))
        except TypeError:               # older jax without pipeline_mode kwarg
            pass
    return pl.BlockSpec(shape, index_map)


# ---------------------------------------------------------------------------
# Conv (use_conv=True): stride-2 3x3 conv as a K-tiled MXU matmul over
# pre-gathered taps (im2col-lite in the wrapper, ~2.25x input bytes).
# ---------------------------------------------------------------------------
def _conv_matmul_kernel(cols_ref, w_ref, b_ref, o_ref, acc_ref):
    # cols_ref: (1, k_tile, tile_s)   w_ref: (Cout, k_tile)
    # b_ref: (Cout, 1) f32            o_ref: (1, Cout, tile_s)
    # acc_ref: (Cout, tile_s) f32 scratch, persists across the K grid axis.
    k = pl.program_id(2)

    @pl.when(k == 0)
    def _init():
        acc_ref[...] = jnp.zeros_like(acc_ref)

    acc_ref[...] += jax.lax.dot_general(
        w_ref[...], cols_ref[0],
        dimension_numbers=(((1,), (0,)), ((), ())),   # no transposed operand
        preferred_element_type=jnp.float32,
    )

    @pl.when(k == pl.num_programs(2) - 1)
    def _finalize():
        o_ref[0] = (acc_ref[...] + b_ref[...]).astype(o_ref.dtype)


def conv2d_downsample(x, weight, bias, *, stride=2, padding=1, compute_dtype=None):
    N, Cin, H, W = x.shape
    Cout, Cin_w, KH, KW = weight.shape
    assert Cin_w == Cin
    Ho = (H + 2 * padding - KH) // stride + 1
    Wo = (W + 2 * padding - KW) // stride + 1
    S = Ho * Wo
    K = KH * KW * Cin

    mm_dtype = jnp.dtype(compute_dtype) if compute_dtype is not None else x.dtype
    in_bytes = jnp.dtype(mm_dtype).itemsize
    out_bytes = jnp.dtype(x.dtype).itemsize

    # --- wrapper-side strided window gather (stride-2 decimation keeps it cheap)
    xp = jnp.pad(x, ((0, 0), (0, 0), (padding, padding), (padding, padding)))
    taps = [xp[:, :, kh:kh + stride * Ho:stride, kw:kw + stride * Wo:stride]
            for kh in range(KH) for kw in range(KW)]
    stacked = jnp.stack(taps, axis=0)                 # (KH*KW, N, Cin, Ho, Wo)

    # Small images: fold the batch into the lane axis so MXU results and
    # stores use all 128 lanes (e.g. 8x8 at the 1280-channel UNet stage).
    fold_batch = (S < 128) and (N > 1)
    if fold_batch:
        cols = stacked.transpose(0, 2, 1, 3, 4).reshape(1, K, N * S)
        n_images, S_eff = 1, N * S
    else:
        cols = stacked.transpose(1, 0, 2, 3, 4).reshape(N, K, S)
        n_images, S_eff = N, S
    cols = cols.astype(mm_dtype)                      # bf16 halves im2col traffic

    # Weight K-order (tap, cin) matches cols; bias stays f32 for the accumulate.
    w2 = jnp.transpose(weight, (0, 2, 3, 1)).reshape(Cout, K).astype(mm_dtype)
    b2 = bias.reshape(Cout, 1).astype(jnp.float32)

    # --- K (contraction) tiling: bounds VMEM independent of Cin.
    if K > 512:
        k_tile = 512                                  # multiple of 128/256 (MXU-friendly)
        K_pad = _round_up(K, k_tile)
    else:
        K_pad = _round_up(K, 8)                       # sublane alignment only
        k_tile = K_pad
    num_k = K_pad // k_tile
    if K_pad != K:
        cols = jnp.pad(cols, ((0, 0), (0, K_pad - K), (0, 0)))
        w2 = jnp.pad(w2, ((0, 0), (0, K_pad - K)))

    # --- VMEM-aware spatial tile; lane axis always a multiple of 128.
    vmem_limit = _vmem_limit_bytes()
    budget = (vmem_limit * 7) // 10
    tile_s = 128
    for cand in (4096, 2048, 1024, 512, 256, 128):
        usage = (2 * k_tile * cand * in_bytes          # cols (double-buffered)
                 + 2 * Cout * k_tile * in_bytes        # weight tile
                 + Cout * cand * 4                     # f32 accumulator scratch
                 + 2 * Cout * cand * out_bytes)        # output (double-buffered)
        if usage <= budget:
            tile_s = cand
            break
    tile_s = min(tile_s, _round_up(S_eff, 128))
    S_pad = _round_up(S_eff, tile_s)

    # v7x megacore: make sure the "parallel" axes expose >= 2 blocks.
    if n_images * (S_pad // tile_s) == 1 and tile_s >= 256:
        tile_s //= 2
    num_s = S_pad // tile_s

    if S_pad != S_eff:
        cols = jnp.pad(cols, ((0, 0), (0, 0), (0, S_pad - S_eff)))

    # Single-buffer the weight only when it is stationary (one K tile) and
    # large enough that halving its residency matters.
    w_stationary = (num_k == 1) and (Cout * k_tile * in_bytes >= (2 << 20))
    w_spec = _block_spec((Cout, k_tile), lambda n, s, k: (0, k),
                         single_buffer=w_stationary)

    out = pl.pallas_call(
        _conv_matmul_kernel,
        out_shape=jax.ShapeDtypeStruct((n_images, Cout, S_pad), x.dtype),
        grid_spec=pltpu.PrefetchScalarGridSpec(
            num_scalar_prefetch=0,
            grid=(n_images, num_s, num_k),
            in_specs=[
                pl.BlockSpec((1, k_tile, tile_s), lambda n, s, k: (n, k, s)),
                w_spec,
                pl.BlockSpec((Cout, 1), lambda n, s, k: (0, 0)),
            ],
            out_specs=pl.BlockSpec((1, Cout, tile_s), lambda n, s, k: (n, 0, s)),
            scratch_shapes=[pltpu.VMEM((Cout, tile_s), jnp.float32)],
        ),
        compiler_params=pltpu.CompilerParams(
            dimension_semantics=("parallel", "parallel", "arbitrary"),
            vmem_limit_bytes=vmem_limit,
        ),
    )(cols, w2, b2)

    out = out[:, :, :S_eff]
    if fold_batch:
        return out.reshape(Cout, N, Ho, Wo).transpose(1, 0, 2, 3)
    return out.reshape(N, Cout, Ho, Wo)


# ---------------------------------------------------------------------------
# AvgPool (use_conv=False): 2x2/2 pooling as a VPU sum of four parity planes,
# flattened to a lane-dense layout and tiled over (N*C) rows.
# ---------------------------------------------------------------------------
def _avg_pool_kernel(x00_ref, x01_ref, x10_ref, x11_ref, o_ref):
    s = (x00_ref[...].astype(jnp.float32) + x01_ref[...].astype(jnp.float32)
         + x10_ref[...].astype(jnp.float32) + x11_ref[...].astype(jnp.float32))
    o_ref[...] = (s * 0.25).astype(o_ref.dtype)


def avg_pool2d_downsample(x):
    N, C, H, W = x.shape
    Ho, Wo = H // 2, W // 2
    R, S = N * C, Ho * Wo
    itemsize = jnp.dtype(x.dtype).itemsize

    # Lane-dense spatial axis (multiple of 128), ~1 MB per ref block.
    s_tile = min(_round_up(S, 128), 2048)
    rows_per_mb = max(8, ((1 << 20) // (s_tile * itemsize)) // 8 * 8)
    r_tile = min(_round_up(R, 8), rows_per_mb)
    R_pad, S_pad = _round_up(R, r_tile), _round_up(S, s_tile)

    # v7x megacore: expose >= 2 parallel blocks when possible.
    if (R_pad // r_tile) * (S_pad // s_tile) == 1:
        if r_tile >= 16:
            r_tile //= 2
        elif s_tile >= 256:
            s_tile //= 2

    xt = x[:, :, :2 * Ho, :2 * Wo]
    planes = [
        jnp.pad(xt[:, :, ph::2, pw::2].reshape(R, S),
                ((0, R_pad - R), (0, S_pad - S)))
        for ph in range(2) for pw in range(2)
    ]
    # TODO(synk): on v5e, extract the H-parity (sublane) split inside the kernel
    # to save one wrapper-side HBM pass; only the W split is lane-hostile.

    blk = pl.BlockSpec((r_tile, s_tile), lambda r, s: (r, s))
    out = pl.pallas_call(
        _avg_pool_kernel,
        out_shape=jax.ShapeDtypeStruct((R_pad, S_pad), x.dtype),
        grid_spec=pltpu.PrefetchScalarGridSpec(
            num_scalar_prefetch=0,
            grid=(R_pad // r_tile, S_pad // s_tile),
            in_specs=[blk, blk, blk, blk],
            out_specs=blk,
        ),
        compiler_params=pltpu.CompilerParams(
            dimension_semantics=("parallel", "parallel"),
            vmem_limit_bytes=_vmem_limit_bytes(),
        ),
    )(*planes)
    return out[:R, :S].reshape(N, C, Ho, Wo)


# ---------------------------------------------------------------------------
# Module-level wrapper mirroring Downsample.forward
# ---------------------------------------------------------------------------
def downsample(x, *, channels, use_conv, dims=2, out_channels=None, padding=1,
               weight=None, bias=None, compute_dtype=None):
    assert x.shape[1] == channels
    out_channels = out_channels or channels
    if dims != 2:
        # TODO(synk): dims=1 and dims=3 (stride (1,2,2)) variants not ported to Pallas yet.
        raise NotImplementedError("Only dims=2 Downsample is implemented in Pallas.")
    if use_conv:
        assert weight is not None and bias is not None
        assert weight.shape[0] == out_channels and weight.shape[1] == channels
        return conv2d_downsample(x, weight, bias, stride=2, padding=padding,
                                 compute_dtype=compute_dtype)
    assert channels == out_channels
    return avg_pool2d_downsample(x)


# ---------------------------------------------------------------------------
# Pure-JAX references (sanity checks)
# ---------------------------------------------------------------------------
def _conv_reference(x, weight, bias, *, stride=2, padding=1):
    out = jax.lax.conv_general_dilated(
        x.astype(jnp.float32), weight.astype(jnp.float32),
        window_strides=(stride, stride),
        padding=((padding, padding), (padding, padding)),
        dimension_numbers=("NCHW", "OIHW", "NCHW"))
    return (out + bias.astype(jnp.float32)[None, :, None, None]).astype(x.dtype)


def _pool_reference(x):
    N, C, H, W = x.shape
    Ho, Wo = H // 2, W // 2
    xt = x[:, :, :2 * Ho, :2 * Wo]
    return xt.reshape(N, C, Ho, 2, Wo, 2).mean(axis=(3, 5)).astype(x.dtype)


if __name__ == "__main__":
    key = jax.random.PRNGKey(0)
    kx, kw, kb, kx2, kw2, kb2 = jax.random.split(key, 6)

    # Case 1: batch-folded conv path (S = 64 < 128) + avg-pool path, f32.
    N, C, H, W = 2, 4, 16, 16
    x = jax.random.normal(kx, (N, C, H, W), dtype=jnp.float32)
    weight = jax.random.normal(kw, (C, C, 3, 3), dtype=jnp.float32) * 0.1
    bias = jax.random.normal(kb, (C,), dtype=jnp.float32) * 0.1

    y_conv = jax.block_until_ready(
        downsample(x, channels=C, use_conv=True, weight=weight, bias=bias))
    ref_conv = _conv_reference(x, weight, bias)
    assert y_conv.shape == (N, C, H // 2, W // 2)
    assert jnp.allclose(y_conv, ref_conv, atol=1e-4, rtol=1e-4), \
        float(jnp.max(jnp.abs(y_conv - ref_conv)))

    y_pool = jax.block_until_ready(downsample(x, channels=C, use_conv=False))
    assert y_pool.shape == (N, C, H // 2, W // 2)
    assert jnp.allclose(y_pool, _pool_reference(x), atol=1e-5, rtol=1e-5)

    # Case 1b: bf16 matmul path (production setting: halves im2col HBM traffic).
    y_bf16 = jax.block_until_ready(
        downsample(x, channels=C, use_conv=True, weight=weight, bias=bias,
                   compute_dtype=jnp.bfloat16))
    assert jnp.allclose(y_bf16, ref_conv, atol=5e-2, rtol=5e-2)

    # Case 2: non-folded conv path (S >= 128) with megacore spatial split, N=1.
    x2 = jax.random.normal(kx2, (1, 4, 32, 32), dtype=jnp.float32)
    y2 = jax.block_until_ready(
        downsample(x2, channels=4, use_conv=True, weight=weight, bias=bias))
    assert jnp.allclose(y2, _conv_reference(x2, weight, bias), atol=1e-4, rtol=1e-4)

    y2p = jax.block_until_ready(downsample(x2, channels=4, use_conv=False))
    assert jnp.allclose(y2p, _pool_reference(x2), atol=1e-5, rtol=1e-5)

    # Case 3: K-tiled conv path (K = 9*64 = 576 > 512 -> 2 K tiles + f32 scratch).
    C3 = 64
    x3 = jax.random.normal(kx2, (1, C3, 16, 16), dtype=jnp.float32)
    w3 = jax.random.normal(kw2, (C3, C3, 3, 3), dtype=jnp.float32) * 0.05
    b3 = jax.random.normal(kb2, (C3,), dtype=jnp.float32) * 0.1
    y3 = jax.block_until_ready(
        downsample(x3, channels=C3, use_conv=True, weight=w3, bias=b3))
    ref3 = _conv_reference(x3, w3, b3)
    assert jnp.allclose(y3, ref3, atol=2e-3, rtol=1e-3), \
        float(jnp.max(jnp.abs(y3 - ref3)))

    print("KERNEL_OK")
</pallas_src>

<mosaic_0001>
module attributes {stable_mosaic.version = 11 : i64} {
  func.func @_conv_matmul_kernel(%arg0: i32, %arg1: i32, %arg2: i32, %arg3: memref<1x40x128xf32, #tpu.memory_space<vmem>>, %arg4: memref<4x40xf32, #tpu.memory_space<vmem>>, %arg5: memref<4x1xf32, #tpu.memory_space<vmem>>, %arg6: memref<1x4x128xf32, #tpu.memory_space<vmem>>, %arg7: memref<4x128xf32, #tpu.memory_space<vmem>>) attributes {dimension_semantics = [#tpu.dimension_semantics<parallel>, #tpu.dimension_semantics<parallel>, #tpu.dimension_semantics<arbitrary>], iteration_bounds = array<i64: 1, 1, 1>, scalar_prefetch = 0 : i64, scratch_operands = 1 : i64, tpu.core_type = #tpu.core_type<tc>, window_params = [{transform_indices = @transform_0, window_bounds = array<i64: 1, 40, 128>}, {transform_indices = @transform_1, window_bounds = array<i64: 4, 40>}, {pipeline_mode = #tpu.pipeline_mode<synchronous>, transform_indices = @transform_2, window_bounds = array<i64: 4, 1>}, {transform_indices = @transform_3, window_bounds = array<i64: 1, 4, 128>}]} {
    %c0_i32 = arith.constant 0 : i32
    %0 = arith.cmpi eq, %arg2, %c0_i32 : i32
    %1 = arith.extui %0 : i1 to i32
    %c0_i32_0 = arith.constant 0 : i32
    %2 = arith.cmpi ne, %1, %c0_i32_0 : i32
    scf.if %2 {
      %cst_11 = arith.constant 0.000000e+00 : f32
      %13 = vector.broadcast %cst_11 : f32 to vector<4x128xf32>
      %c0_12 = arith.constant 0 : index
      %c0_13 = arith.constant 0 : index
      %14 = vector.load %arg7[%c0_12, %c0_13] : memref<4x128xf32, #tpu.memory_space<vmem>>, vector<4x128xf32>
      tpu.vector_store %arg7[%c0_12, %c0_13], %13 {strides = array<i32>} : memref<4x128xf32, #tpu.memory_space<vmem>>, vector<4x128xf32>,
    } else {
    }
    %c0 = arith.constant 0 : index
    %c0_1 = arith.constant 0 : index
    %3 = vector.load %arg7[%c0, %c0_1] : memref<4x128xf32, #tpu.memory_space<vmem>>, vector<4x128xf32>
    %c0_2 = arith.constant 0 : index
    %c0_3 = arith.constant 0 : index
    %4 = vector.load %arg4[%c0_2, %c0_3] : memref<4x40xf32, #tpu.memory_space<vmem>>, vector<4x40xf32>
    %c0_4 = arith.constant 0 : index
    %c0_5 = arith.constant 0 : index
    %c0_6 = arith.constant 0 : index
    %5 = vector.load %arg3[%c0_4, %c0_5, %c0_6] : memref<1x40x128xf32, #tpu.memory_space<vmem>>, vector<1x40x128xf32>
    %6 = vector.shape_cast %5 : vector<1x40x128xf32> to vector<40x128xf32>
    %cst = arith.constant dense<0.000000e+00> : vector<4x128xf32>
    %7 = tpu.matmul %4, %6, %cst {dimension_numbers = #tpu.dot_dimension_numbers<[1], [0], [0], [1], [0, 0, 1, 1], [], []>} : vector<4x40xf32>, vector<40x128xf32>, vector<4x128xf32> -> vector<4x128xf32>
    %8 = arith.addf %3, %7 : vector<4x128xf32>
    %c0_7 = arith.constant 0 : index
    %c0_8 = arith.constant 0 : index
    %9 = vector.load %arg7[%c0_7, %c0_8] : memref<4x128xf32, #tpu.memory_space<vmem>>, vector<4x128xf32>
    tpu.vector_store %arg7[%c0_7, %c0_8], %8 {strides = array<i32>} : memref<4x128xf32, #tpu.memory_space<vmem>>, vector<4x128xf32>,
    %c0_i32_9 = arith.constant 0 : i32
    %10 = arith.cmpi eq, %arg2, %c0_i32_9 : i32
    %11 = arith.extui %10 : i1 to i32
    %c0_i32_10 = arith.constant 0 : i32
    %12 = arith.cmpi ne, %11, %c0_i32_10 : i32
    scf.if %12 {
      %c0_11 = arith.constant 0 : index
      %c0_12 = arith.constant 0 : index
      %13 = vector.load %arg7[%c0_11, %c0_12] : memref<4x128xf32, #tpu.memory_space<vmem>>, vector<4x128xf32>
      %c0_13 = arith.constant 0 : index
      %c0_14 = arith.constant 0 : index
      %14 = vector.load %arg5[%c0_13, %c0_14] : memref<4x1xf32, #tpu.memory_space<vmem>>, vector<4x1xf32>
      %15 = vector.broadcast %14 : vector<4x1xf32> to vector<4x128xf32>
      %16 = arith.addf %13, %15 : vector<4x128xf32>
      %c0_15 = arith.constant 0 : index
      %c0_16 = arith.constant 0 : index
      %c0_17 = arith.constant 0 : index
      %17 = vector.load %arg6[%c0_15, %c0_16, %c0_17] : memref<1x4x128xf32, #tpu.memory_space<vmem>>, vector<1x4x128xf32>
      %18 = vector.shape_cast %17 : vector<1x4x128xf32> to vector<4x128xf32>
      %19 = vector.shape_cast %16 : vector<4x128xf32> to vector<1x4x128xf32>
      tpu.vector_store %arg6[%c0_15, %c0_16, %c0_17], %19 {strides = array<i32>} : memref<1x4x128xf32, #tpu.memory_space<vmem>>, vector<1x4x128xf32>,
    } else {
    }
    return
  }
  func.func @transform_0(%arg0: i32, %arg1: i32, %arg2: i32) -> (i32, i32, i32) {
    %c0_i32 = arith.constant 0 : i32
    return %arg0, %arg2, %arg1 : i32, i32, i32
  }
  func.func @transform_1(%arg0: i32, %arg1: i32, %arg2: i32) -> (i32, i32) {
    %c0_i32 = arith.constant 0 : i32
    %c0_i32_0 = arith.constant 0 : i32
    return %c0_i32, %arg2 : i32, i32
  }
  func.func @transform_2(%arg0: i32, %arg1: i32, %arg2: i32) -> (i32, i32) {
    %c0_i32 = arith.constant 0 : i32
    %c0_i32_0 = arith.constant 0 : i32
    %c0_i32_1 = arith.constant 0 : i32
    return %c0_i32, %c0_i32_0 : i32, i32
  }
  func.func @transform_3(%arg0: i32, %arg1: i32, %arg2: i32) -> (i32, i32, i32) {
    %c0_i32 = arith.constant 0 : i32
    %c0_i32_0 = arith.constant 0 : i32
    return %arg0, %c0_i32, %arg1 : i32, i32, i32
  }
}

</mosaic_0001>

<bundles_post_ra>
// kernel: tpu_custom_call.1
= control target key start
LH: loop header
LB: loop body
LE: loop exit
PB: predicated region body
PF: predicated region fallthrough
CT: control target
= control target key end

     0   :  { %8 = vsyncpa [#allocation4], 0  ;;  %s285_s0 = inlined_call_operand.hbm [shape: f32[1,40,128], index: 0, kind: input, shape index: {}]   ;;  %s286_s1 = inlined_call_operand.vmem [shape: f32[4,40], index: 1, kind: input, shape index: {}]   ;;  %s287_s2 = inlined_call_operand.vmem [shape: f32[4,1], index: 2, kind: input, shape index: {}]   ;;  %s288_s3 = inlined_call_operand.hbm [shape: f32[1,4,128], index: 3, kind: output, shape index: {}]  }
   0x1   :  { %9 = vsyncpa [#allocation5], 0  ;;  %s227_s12 = smov [#allocation3]   ;;  %s179_s16 = scalar_lea.hbm %s285_s0, 640 }
   0x2   :  { %s15_s13 = sshll.u32 %s227_s12, 4  ;;  %p180_p0 = scmp.ne.s32.totalorder %s285_s0, %s179_s16  ;;  %s16_s13 = int_to_ptr.vmem [resolvable:$true] %s15_s13 }
   0x3   :  { %p183_p1 = scmp.lt.u32.totalorder %s179_s16, %s285_s0 }
   0x5   :  { %p185_p2 = pnand %p183_p1, %p180_p0 }
   0x7   :  { %188 = shalt.err (!%p185_p2)
}
   0x8   :  { %s189_s21 = scalar_lea.vmem %s16_s13, 640  ;;  %p194_p4 = scmp.lt.s32.totalorder %s16_s13, %s16_s13 }
   0x9   :  { %p190_p3 = scmp.ne.s32.totalorder %s16_s13, %s189_s21  ;;  %p195_p5 = scmp.lt.s32.totalorder %s189_s21, %s189_s21 }
   0xb   :  { %p196_p6 = por %p195_p5, %p194_p4 }
   0xd   :  { %p197_p7 = pnand %p196_p6, %p190_p3 }
   0xf   :  { %200 = shalt.err (!%p197_p7)
}
  0x10   :  { %s228_s22 = smov 128   ;;  %s229_s23 = smov 8  }
  0x11   :  { %21 = dma.hbm_to_vmem [thread:$0]  %s285_s0, 640, %s16_s13, [#allocation4], %s228_s22, %s228_s22, %s229_s23  }
  0x12   :  { %223 = dma.done.wait [#allocation4], 640  }
  0x13   :  { %224 = vsyncadd [#allocation4], 4294966656  ;;  %v230_v0 = vmov 0.0|0.0   ;;  %v231_v1 = vmov 0.0   ;;  %vm232_vm0 = vmmov 0   ;;  %v233_v2 = vmov 0  }
  0x14   :  { %164 = vmatprep.subr.bf16.mxu0 %v230_v0  ;;  %33 = vst [vmem:[#allocation2] sm:$0xf] %v231_v1  ;;  %161 = vmatprep.mubr.msk.f32.mxu0 %vm232_vm0, %v231_v1  ;;  %v36_v3 = vld [vmem:[#allocation3] sm:$0xff]  ;;  %v37_v4 = vld [vmem:[#allocation3 + $0x8] sm:$0xff]  ;;  %v38_v5 = vld [vmem:[#allocation3 + $0x10] sm:$0xff]  ;;  %vm41_vm1 = vcmask 326656  }
  0x15   :  { %178 = vset.pattern.permute.xlu0 %v233_v2  ;;  %v165_v6 = vpack.c.bf16 %v37_v4, %v36_v3  ;;  %v39_v7 = vld [vmem:[#allocation3 + $0x18] sm:$0xff]  ;;  %v40_v10 = vld [vmem:[#allocation3 + $0x20] sm:$0xff] }
  0x16   :  { %v121_v8 = vld [vmem:[%s287_s2] sm:$0xf]  ;;  %v168_v9 = vpack.c.bf16 %v39_v7, %v38_v5  ;;  %s234_s2 = smov [#allocation6]  }
  0x17   :  { %166 = vmatpush3.bf16.msra.mxu0 %v165_v6  ;;  %124 = vperm.xlu0 %178, %v121_v8   ;;  %v35_v11 = vld [vmem:[%s286_s1] sm:$0xf]  ;;  %s135_s29 = sshll.u32 %s234_s2, 4  ;;  %s136_s29 = int_to_ptr.vmem [resolvable:$true] %s135_s29 }
  0x18   :  { %167 = vmatprep.subr.bf16.mxu0 %v230_v0  ;;  %s201_s30 = scalar_lea.vmem %s136_s29, 64  ;;  %p206_p9 = scmp.lt.s32.totalorder %s136_s29, %s136_s29 }
  0x19   :  { %p202_p8 = scmp.ne.s32.totalorder %s136_s29, %s201_s30  ;;  %p207_p10 = scmp.lt.s32.totalorder %s201_s30, %s201_s30 }
  0x1b   :  { %169 = vmatpush3.bf16.msra.mxu0 %v168_v9  ;;  %v34_v12 = vld [vmem:[#allocation2] sm:$0xf]  ;;  %p208_p11 = por %p207_p10, %p206_p9 }
  0x1c   :  { %159 = vmatprep.subr.mxu0 %v231_v1 }
  0x1d   :  { %p209_p12 = pnand %p208_p11, %p202_p8 }
  0x1f   :  { %160 = vmatpush3.msra.mxu0 %v40_v10 }
  0x20   :  { %162 = vmatmul.mubr.msk.f32.vlgmr.msra.gmra.mrb[0].mxu0 %vm41_vm1, %v35_v11 }
  0x96   :  { %v125_v16 = vpop.permute.xlu0 %124 }
  0xf3   :  { %v111_v13 = vpop.f32.mrb[0].mxu0 }
  0xf4   :  { %v115_v14 = vadd.f32 %v111_v13, %v34_v12  ;;  %v163_v15 = vpop.f32.mrb[1].mxu0 }
  0xf6   :  { %116 = vst [vmem:[#allocation2] sm:$0xf] %v115_v14 }
  0xfd   :  { %v120_v17 = vld [vmem:[#allocation2] sm:$0xf] }
  0xfe   :  { %v127_v18 = vadd.f32 %v125_v16, %v120_v17 }
 0x100   :  { %128 = vst [vmem:[#allocation6] sm:$0xf] %v127_v18 }
 0x101   :  { %212 = shalt.err (!%p209_p12)
}
 0x102   :  { %s213_s5 = scalar_lea.hbm %s288_s3, 64 }
 0x103   :  { %p214_p13 = scmp.ne.s32.totalorder %s288_s3, %s213_s5  ;;  %p217_p0 = scmp.lt.u32.totalorder %s213_s5, %s288_s3 }
 0x105   :  { %p219_p1 = pnand %p217_p0, %p214_p13 }
 0x107   :  { %222 = shalt.err (!%p219_p1)
}
 0x108   :  { %138 = dma.vmem_to_hbm [thread:$0]  %s136_s29, 64, %s288_s3, [#allocation5]  }
 0x109   :  { %225 = dma.done.wait [#allocation5], 64  }
 0x10a   :  { %226 = vsyncadd [#allocation5], 4294967232 }
 0x10b   :  { %142 = vsyncpa [#allocation4], 1 }
 0x10c   :  { %143 = vsyncpa [#allocation5], 1 }

</bundles_post_ra>
